<compile_context>
chip_gen: v7x
topology: tpu7x:2x2x1
jax: 0.10.0
libtpu: 0.0.40
codegen_flags: <defaults>
</compile_context>

<pallas_src>
import jax
import jax.numpy as jnp
from jax import lax
from jax.experimental import pallas as pl
from jax.experimental.pallas import tpu as pltpu


def _round_up(x: int, m: int) -> int:
    return ((x + m - 1) // m) * m


def sine_activation_kernel(tau_ref, w_ref, b_ref, out_ref):
    # tau_ref: (tm, F), w_ref: (F, K), b_ref: (1, K), out_ref: (tm, K)
    # Single fused matmul covers both the periodic part (first K-1 cols) and the
    # linear part (last col).  Output write is one contiguous full-tile store.
    y = jnp.dot(tau_ref[...], w_ref[...], preferred_element_type=jnp.float32) + b_ref[...]
    k = y.shape[-1]
    col = lax.broadcasted_iota(jnp.int32, y.shape, dimension=1)
    y = jnp.where(col < (k - 1), jnp.sin(y), y)   # sin on periodic cols, identity on last
    out_ref[...] = y.astype(out_ref.dtype)


def sine_activation(tau, w, b, w0, b0, *, tm=1024):
    """Pallas wrapper for SineActivation.forward (Time2Vec).

    tau: (N, in_features); w: (in_features, out_features-1); b: (out_features-1,)
    w0:  (in_features, 1);  b0: (1,)
    returns: (N, out_features) = concat(sin(tau@w + b), tau@w0 + b0)
    """
    N, F = tau.shape
    K1 = w.shape[1]
    out_features = K1 + 1

    # Fuse the two affine maps into one: w_full (F, out_features), b_full (1, out_features).
    w_full = jnp.concatenate([w, w0], axis=1)
    b_full = jnp.concatenate([b, b0.reshape(1)], axis=0).reshape(1, out_features)

    # Row tile: large to amortize per-grid-step overhead, multiple of 8 (sublane),
    # capped at ~N/2 so large-N cases keep >=2 grid steps (v7x megacore sharding).
    half_n = _round_up(max(N // 2, 8), 8)
    tm_eff = max(8, min(tm, half_n))
    n_pad = _round_up(N, tm_eff)

    tau_p = tau if n_pad == N else jnp.pad(tau, ((0, n_pad - N), (0, 0)))
    grid = (n_pad // tm_eff,)

    cost = pl.CostEstimate(
        flops=2 * n_pad * F * out_features,
        transcendentals=n_pad * (out_features - 1),
        bytes_accessed=4 * (n_pad * F + n_pad * out_features
                            + F * out_features + out_features),
    )

    out = pl.pallas_call(
        sine_activation_kernel,
        out_shape=jax.ShapeDtypeStruct((n_pad, out_features), tau.dtype),
        grid=grid,
        in_specs=[
            pl.BlockSpec((tm_eff, F), lambda i: (i, 0)),           # tau row tile
            pl.BlockSpec((F, out_features), lambda i: (0, 0)),     # fused weights (resident)
            pl.BlockSpec((1, out_features), lambda i: (0, 0)),     # fused bias   (resident)
        ],
        out_specs=pl.BlockSpec((tm_eff, out_features), lambda i: (i, 0)),
        compiler_params=pltpu.CompilerParams(
            dimension_semantics=("parallel",),
        ),
        cost_estimate=cost,
    )(tau_p, w_full, b_full)

    return out[:N] if n_pad != N else out


if __name__ == "__main__":
    key = jax.random.PRNGKey(0)
    k_tau, k_w0, k_b0, k_w, k_b = jax.random.split(key, 5)

    # Small shapes consistent with the module: batch=8 rows, in_features=4, out_features=32.
    N, in_features, out_features = 8, 4, 32

    tau = jax.random.normal(k_tau, (N, in_features), dtype=jnp.float32)

    # nn.Parameter(torch.randn(...)) shapes.
    w0 = jax.random.normal(k_w0, (in_features, 1), dtype=jnp.float32)
    b0 = jax.random.normal(k_b0, (1,), dtype=jnp.float32)
    w = jax.random.normal(k_w, (in_features, out_features - 1), dtype=jnp.float32)
    b = jax.random.normal(k_b, (out_features - 1,), dtype=jnp.float32)

    out = sine_activation(tau, w, b, w0, b0)
    out = jax.block_until_ready(out)

    # Pure-JAX reference (same math as the torch t2v helper).
    ref = jnp.concatenate([jnp.sin(tau @ w + b), tau @ w0 + b0], axis=-1)
    assert out.shape == (N, out_features)
    assert jnp.allclose(out, ref, atol=1e-5, rtol=1e-5)

    # Also exercise a larger, non-tile-divisible batch to check the padding path.
    N2 = 3000
    tau2 = jax.random.normal(jax.random.PRNGKey(1), (N2, in_features), dtype=jnp.float32)
    out2 = jax.block_until_ready(sine_activation(tau2, w, b, w0, b0))
    ref2 = jnp.concatenate([jnp.sin(tau2 @ w + b), tau2 @ w0 + b0], axis=-1)
    assert out2.shape == (N2, out_features)
    assert jnp.allclose(out2, ref2, atol=1e-5, rtol=1e-5)

    print("KERNEL_OK")
</pallas_src>

<mosaic_0001>
module attributes {stable_mosaic.version = 11 : i64} {
  func.func @sine_activation_kernel(%arg0: i32, %arg1: memref<8x4xf32, #tpu.memory_space<vmem>>, %arg2: memref<4x32xf32, #tpu.memory_space<vmem>>, %arg3: memref<1x32xf32, #tpu.memory_space<vmem>>, %arg4: memref<8x32xf32, #tpu.memory_space<vmem>>) attributes {dimension_semantics = [#tpu.dimension_semantics<parallel>], iteration_bounds = array<i64: 1>, scalar_prefetch = 0 : i64, scratch_operands = 0 : i64, tpu.core_type = #tpu.core_type<tc>, window_params = [{transform_indices = @transform_0, window_bounds = array<i64: 8, 4>}, {pipeline_mode = #tpu.pipeline_mode<synchronous>, transform_indices = @transform_1, window_bounds = array<i64: 4, 32>}, {pipeline_mode = #tpu.pipeline_mode<synchronous>, transform_indices = @transform_2, window_bounds = array<i64: 1, 32>}, {transform_indices = @transform_3, window_bounds = array<i64: 8, 32>}]} {
    %c0 = arith.constant 0 : index
    %c0_0 = arith.constant 0 : index
    %0 = vector.load %arg1[%c0, %c0_0] : memref<8x4xf32, #tpu.memory_space<vmem>>, vector<8x4xf32>
    %c0_1 = arith.constant 0 : index
    %c0_2 = arith.constant 0 : index
    %1 = vector.load %arg2[%c0_1, %c0_2] : memref<4x32xf32, #tpu.memory_space<vmem>>, vector<4x32xf32>
    %cst = arith.constant dense<0.000000e+00> : vector<8x32xf32>
    %2 = tpu.matmul %0, %1, %cst {dimension_numbers = #tpu.dot_dimension_numbers<[1], [0], [0], [1], [0, 0, 1, 1], [], []>} : vector<8x4xf32>, vector<4x32xf32>, vector<8x32xf32> -> vector<8x32xf32>
    %c0_3 = arith.constant 0 : index
    %c0_4 = arith.constant 0 : index
    %3 = vector.load %arg3[%c0_3, %c0_4] : memref<1x32xf32, #tpu.memory_space<vmem>>, vector<1x32xf32>
    %4 = vector.broadcast %3 : vector<1x32xf32> to vector<8x32xf32>
    %5 = arith.addf %2, %4 : vector<8x32xf32>
    %6 = tpu.iota {dimensions = array<i32: 1>} : vector<8x32xi32>
    %c31_i32 = arith.constant 31 : i32
    %7 = vector.broadcast %c31_i32 : i32 to vector<8x32xi32>
    %8 = arith.cmpi slt, %6, %7 : vector<8x32xi32>
    %9 = math.sin %5 : vector<8x32xf32>
    %10 = arith.select %8, %9, %5 : vector<8x32xi1>, vector<8x32xf32>
    %c0_5 = arith.constant 0 : index
    %c0_6 = arith.constant 0 : index
    %11 = vector.load %arg4[%c0_5, %c0_6] : memref<8x32xf32, #tpu.memory_space<vmem>>, vector<8x32xf32>
    tpu.vector_store %arg4[%c0_5, %c0_6], %10 {strides = array<i32>} : memref<8x32xf32, #tpu.memory_space<vmem>>, vector<8x32xf32>,
    return
  }
  func.func @transform_0(%arg0: i32) -> (i32, i32) {
    %c0_i32 = arith.constant 0 : i32
    %c0_i32_0 = arith.constant 0 : i32
    return %arg0, %c0_i32 : i32, i32
  }
  func.func @transform_1(%arg0: i32) -> (i32, i32) {
    %c0_i32 = arith.constant 0 : i32
    %c0_i32_0 = arith.constant 0 : i32
    %c0_i32_1 = arith.constant 0 : i32
    return %c0_i32, %c0_i32_0 : i32, i32
  }
  func.func @transform_2(%arg0: i32) -> (i32, i32) {
    %c0_i32 = arith.constant 0 : i32
    %c0_i32_0 = arith.constant 0 : i32
    %c0_i32_1 = arith.constant 0 : i32
    return %c0_i32, %c0_i32_0 : i32, i32
  }
  func.func @transform_3(%arg0: i32) -> (i32, i32) {
    %c0_i32 = arith.constant 0 : i32
    %c0_i32_0 = arith.constant 0 : i32
    return %arg0, %c0_i32 : i32, i32
  }
}

</mosaic_0001>

<bundles_post_ra>
// kernel: tpu_custom_call.1
= control target key start
LH: loop header
LB: loop body
LE: loop exit
PB: predicated region body
PF: predicated region fallthrough
CT: control target
= control target key end

     0   :  { %vm28_vm0 = vcmask 1043456   ;;  %v281_v2 = vmov 0.0   ;;  %vm282_vm1 = vmmov 0   ;;  %vm24_vm2 = vcmask 31744   ;;  %s353_s0 = inlined_call_operand.vmem [shape: f32[8,4], index: 0, kind: input, shape index: {}]   ;;  %s354_s1 = inlined_call_operand.vmem [shape: f32[4,32], index: 1, kind: input, shape index: {}]   ;;  %s355_s2 = inlined_call_operand.vmem [shape: f32[1,32], index: 2, kind: input, shape index: {}]   ;;  %s356_s3 = inlined_call_operand.hbm [shape: f32[8,32], index: 3, kind: output, shape index: {}]  }
   0x1   :  { %v16_v0 = vld [vmem:[%s354_s1] sm:$0xf]  ;;  %235 = vmatprep.subr.mxu0 %v281_v2  ;;  %237 = vmatprep.mubr.msk.f32.mxu0 %vm282_vm1, %v281_v2 }
   0x2   :  { %v15_v1 = vld [vmem:[%s353_s0] sm:$0xff] }
   0x3   :  { %8 = vsyncpa [#allocation3], 0  ;;  %236 = vmatpush3.msk.msra.mxu0 %vm28_vm0, %v16_v0  ;;  %v226_v3 = vld [vmem:[%s355_s2] ss:$0 sm:$0xff]  ;;  %v283_v18 = vmov 2102212464  }
   0x4   :  { %238 = vmatmul.mubr.msk.f32.vlgmr.msra.gmra.mrb[0].mxu0 %vm24_vm2, %v15_v1  ;;  %v284_v20 = vmov 920167782   ;;  %v285_v24 = vmov 1326507024   ;;  %v286_v26 = vmov 683565275  }
   0x5   :  { %v287_v28 = vmov 2475754826   ;;  %v288_v31 = vmov 2131351028   ;;  %s289_s0 = smov [#allocation2]   ;;  %vm210_vm1 = vcmask 261120  }
   0x6   :  { %s218_s1 = sshll.u32 %s289_s0, 4  ;;  %s219_s1 = int_to_ptr.vmem [resolvable:$true] %s218_s1 }
   0x7   :  { %s257_s2 = scalar_lea.vmem %s219_s1, 128  ;;  %p262_p1 = scmp.lt.s32.totalorder %s219_s1, %s219_s1 }
   0x8   :  { %p258_p0 = scmp.ne.s32.totalorder %s219_s1, %s257_s2  ;;  %p263_p2 = scmp.lt.s32.totalorder %s257_s2, %s257_s2 }
   0xa   :  { %p264_p3 = por %p263_p2, %p262_p1 }
   0xc   :  { %p265_p4 = pnand %p264_p3, %p258_p0 }
  0xd7   :  { %v98_v4 = vpop.f32.mrb[0].mxu0 }
  0xd8   :  { %v319_v5 = vadd.f32 %v226_v3, %v98_v4  ;;  %v239_v6 = vpop.f32.mrb[1].mxu0 }
  0xda   :  { %v108_v7 = vand.u32 2139095040, %v319_v5  ;;  %v105_v8 = vand.u32 2147483647, %v319_v5  ;;  %vm107_vm10 = vcmp.lt.s32.totalorder %v319_v5, 0  ;;  %vm197_vm0 = vweird.f32 %v319_v5 }
  0xdc   :  { %v109_v9 = vshrl.u32 %v108_v7, 23  ;;  %v112_v11 = vand.u32 8388607, %v105_v8  ;;  %vm106_vm11 = vcmp.le.f32.partialorder %v105_v8, 0.7853982 }
  0xde   :  { %v229_v10 = vadd.s32 4294967169, %v109_v9  ;;  %v113_v14 = vor.u32 8388608, %v112_v11 }
  0xe0   :  { %v115_v12 = vadd.s32 1, %v229_v10  ;;  %v153_v22 = vshll.u32 %v113_v14, 8 }
  0xe2   :  { %vm116_vm3 = vcmp.gt.s32.totalorder %v115_v12, 0 }
  0xe3   :  { %v117_v13 = vsel %vm116_vm3, %v115_v12, 0 }
  0xe4   :  { %v119_v15 = vand.u32 31, %v117_v13  ;;  %v118_v16 = vshrl.u32 %v117_v13, 5 }
  0xe6   :  { %v120_v17 = vsub.s32 32, %v119_v15  ;;  %v131_v19 = vshll.u32 %v283_v18, %v119_v15  ;;  %v134_v21 = vshll.u32 %v284_v20, %v119_v15  ;;  %v122_v27 = vshll.u32 %v286_v26, %v119_v15 }
  0xe7   :  { %v125_v30 = vshll.u32 %v287_v28, %v119_v15  ;;  %v128_v33 = vshll.u32 %v288_v31, %v119_v15  ;;  %vm140_vm4 = vcmp.lt.s32.totalorder %v118_v16, 4  ;;  %vm137_vm5 = vcmp.lt.s32.totalorder %v118_v16, 1 }
  0xe8   :  { %v132_v23 = vshrl.u32 %v284_v20, %v120_v17  ;;  %v135_v25 = vshrl.u32 %v285_v24, %v120_v17  ;;  %v123_v29 = vshrl.u32 %v287_v28, %v120_v17  ;;  %v126_v32 = vshrl.u32 %v288_v31, %v120_v17 }
  0xe9   :  { %v129_v34 = vshrl.u32 %v283_v18, %v120_v17  ;;  %v121_v38 = vshrl.u32 %v286_v26, %v120_v17  ;;  %vm138_vm6 = vcmp.lt.s32.totalorder %v118_v16, 2  ;;  %vm139_vm7 = vcmp.lt.s32.totalorder %v118_v16, 3 }
  0xea   :  { %v133_v35 = vor.u32 %v132_v23, %v131_v19  ;;  %v136_v36 = vor.u32 %v135_v25, %v134_v21  ;;  %v124_v37 = vor.u32 %v123_v29, %v122_v27  ;;  %v127_v39 = vor.u32 %v126_v32, %v125_v30 }
  0xeb   :  { %v130_v40 = vor.u32 %v129_v34, %v128_v33  ;;  %v102_v27 = vlaneseq }
  0xec   :  { %v146_v41 = vsel %vm140_vm4, %v133_v35, 920167782  ;;  %v150_v42 = vsel %vm140_vm4, %v136_v36, 1326507024  ;;  %v145_v44 = vsel %vm137_vm5, %v124_v37, %v127_v39  ;;  %v141_v47 = vsel %vm137_vm5, %v121_v38, %v124_v37 }
  0xed   :  { %v142_v43 = vsel %vm140_vm4, %v130_v40, 2102212464  ;;  %v147_v45 = vsel %vm139_vm7, %v130_v40, %v146_v41  ;;  %v149_v46 = vsel %vm137_vm5, %v127_v39, %v130_v40  ;;  %v151_v50 = vsel %vm139_vm7, %v133_v35, %v150_v42 }
  0xee   :  { %v143_v48 = vsel %vm139_vm7, %v127_v39, %v142_v43  ;;  %v148_v49 = vsel %vm138_vm6, %v145_v44, %v147_v45  ;;  %v152_v51 = vsel %vm138_vm6, %v149_v46, %v151_v50  ;;  %v103_v30 = vand.u32 127, %v102_v27 }
  0xef   :  { %v325_v52 = vmul.u32.u64.low %v153_v22, %v148_v49  ;;  %v326_v53 = vmul.u32.u64.high %v153_v22, %v148_v49, %v325_v52  ;;  %v328_v54 = vmul.u32.u64.low %v153_v22, %v152_v51  ;;  %v329_v55 = vmul.u32.u64.high %v153_v22, %v152_v51, %v328_v54 }
  0xf0   :  { %v144_v56 = vsel %vm138_vm6, %v141_v47, %v143_v48  ;;  %vm104_vm14 = vcmp.lt.s32.totalorder %v103_v30, 31 }
  0xf1   :  { %v163_v57 = vadd.s32 1, %v326_v53  ;;  %v160_v58 = vmul.u32 %v153_v22, %v144_v56  ;;  %vm162_vm8 = vc.u32 %v329_v55, %v325_v52  ;;  %v161_v7 = vadd.s32 %v325_v52, %v329_v55 }
  0xf3   :  { %v164_v59 = vsel %vm162_vm8, %v163_v57, %v326_v53 }
  0xf4   :  { %v165_v60 = vadd.s32 %v164_v59, %v160_v58 }
  0xf6   :  { %v166_v61 = vadd.s32 536870912, %v165_v60 }
  0xf8   :  { %v167_v62 = vshrl.u32 %v166_v61, 30 }
  0xfa   :  { %v168_v63 = vshll.u32 %v167_v62, 30  ;;  %v191_v20 = vsub.s32 4, %v167_v62 }
  0xfc   :  { %v169_v0 = vsub.s32 %v165_v60, %v168_v63  ;;  %v192_v23 = vsel %vm107_vm10, %v191_v20, %v167_v62 }
  0xfd   :  { %v194_v25 = vsel %vm106_vm11, 0, %v192_v23 }
  0xfe   :  { %v171_v1 = vsub.s32 0, %v169_v0  ;;  %v198_v26 = vadd.s32 3, %v194_v25 }
 0x100   :  { %v230_v2 = vmin.u32 %v171_v1, %v169_v0  ;;  %v199_v28 = vand.u32 3, %v198_v26 }
 0x102   :  { %v173_v3 = vclz %v230_v2  ;;  %vm204_vm12 = vcmp.eq.s32.totalorder %v199_v28, 2  ;;  %vm201_vm13 = vcmp.eq.s32.totalorder %v199_v28, 0  ;;  %vm200_vm15 = vcmp.lt.s32.totalorder %v199_v28, 2 }
 0x104   :  { %v231_v4 = vadd.s32 4294967294, %v173_v3 }
 0x106   :  { %vm232_vm9 = vcmp.lt.s32.totalorder %v231_v4, 0 }
 0x107   :  { %v176_v6 = vsel %vm232_vm9, 0, %v231_v4 }
 0x108   :  { %v177_v9 = vsub.s32 32, %v176_v6  ;;  %v181_v10 = vsub.s32 4294967266, %v176_v6  ;;  %v178_v11 = vshll.u32 %v169_v0, %v176_v6 }
 0x10a   :  { %v179_v12 = vshrl.u32 %v161_v7, %v177_v9  ;;  %v182_v13 = vadd.s32 127, %v181_v10 }
 0x10c   :  { %v180_v14 = vor.u32 %v179_v12, %v178_v11  ;;  %v183_v15 = vshll.u32 %v182_v13, 23 }
 0x10e   :  { %v184_v16 = vor.u32 4788187, %v183_v15  ;;  %v187_v18 = vcvt.s32.f32 %v180_v14 }
 0x110   :  { %v185_v17 = vand.u32 2147483647, %v184_v16 }
 0x112   :  { %v188_v19 = vmul.f32 %v187_v18, %v185_v17 }
 0x114   :  { %v189_v21 = vxor.u32 2147483648, %v188_v19 }
 0x116   :  { %v190_v22 = vsel %vm107_vm10, %v189_v21, %v188_v19 }
 0x117   :  { %v193_v24 = vsel %vm106_vm11, %v319_v5, %v190_v22 }
 0x118   :  { %253 = vcosq.f32 %v193_v24 }
 0x119   :  { %255 = vsinq.f32 %v193_v24 }
 0x122   :  { %v254_v29 = vpop.eup %253 }
 0x123   :  { %v256_v31 = vpop.eup %255  ;;  %v205_v32 = vxor.u32 2147483648, %v254_v29 }
 0x124   :  { %v202_v33 = vxor.u32 2147483648, %v256_v31 }
 0x125   :  { %v206_v34 = vsel %vm204_vm12, %v205_v32, %v256_v31 }
 0x126   :  { %v203_v8 = vsel %vm201_vm13, %v254_v29, %v202_v33 }
 0x127   :  { %v207_v35 = vsel %vm200_vm15, %v203_v8, %v206_v34 }
 0x128   :  { %v208_v36 = vsel %vm197_vm0, nan, %v207_v35 }
 0x129   :  { %v209_v37 = vsel %vm104_vm14, %v208_v36, %v319_v5 }
 0x12a   :  { %211 = vst.msk [vmem:[#allocation2] sm:$0xff] %vm210_vm1, %v209_v37 }
 0x12b   :  { %268 = shalt.err (!%p265_p4)
}
 0x12c   :  { %s269_s20 = scalar_lea.hbm %s356_s3, 128 }
 0x12d   :  { %p270_p5 = scmp.ne.s32.totalorder %s356_s3, %s269_s20  ;;  %p273_p6 = scmp.lt.u32.totalorder %s269_s20, %s356_s3 }
 0x12f   :  { %p275_p7 = pnand %p273_p6, %p270_p5 }
 0x131   :  { %278 = shalt.err (!%p275_p7)
}
 0x132   :  { %221 = dma.vmem_to_hbm [thread:$0]  %s219_s1, 128, %s356_s3, [#allocation3]  }
 0x133   :  { %279 = dma.done.wait [#allocation3], 128  }
 0x134   :  { %280 = vsyncadd [#allocation3], 4294967168 }
 0x135   :  { %225 = vsyncpa [#allocation3], 1 }

</bundles_post_ra>
